<compile_context>
chip_gen: v7x
topology: tpu7x:2x2x1
jax: 0.10.0
libtpu: 0.0.40
codegen_flags: <defaults>
</compile_context>

<pallas_src>
import jax
import jax.numpy as jnp
from jax import lax
from jax.experimental import pallas as pl
from jax.experimental.pallas import tpu as pltpu

# ----------------------------- model config ---------------------------------
B = 2                  # real batch size
BP = 8                 # batch padded to a full sublane tile (8)
H = 128                # hidden size (lane-aligned)
V = 128                # vocab size (lane-aligned)
MAX_INPUT_LEN = 8      # config.max_input_length
MAX_NEW_TOKENS = 4     # config.generation_kwargs['max_new_tokens']
TOK_PAD = 128          # lane-dense width of the generated-token output (== V)
EOS_ID = 2             # config.tokenizer.eos_token_id


# ------------------------------ Pallas kernel -------------------------------
def _generate_kernel(tok0_ref, htab_ref, wv_ref, hs_ref, tok_ref):
    """Entire greedy decode (MAX_NEW_TOKENS steps) in one invocation.

    tok0_ref : VMEM i32 [BP, 1]        last prompt token per row
    htab_ref : VMEM bf16[V, H]         folded table tanh(emb @ Wh + bh)
    wv_ref   : VMEM bf16[H, V]         output projection
    hs_ref   : VMEM f32 [T, BP, H]     per-step hidden states (written per step)
    tok_ref  : VMEM i32 [BP, TOK_PAD]  generated tokens (written once at end)
    """
    # Hoisted constants (JAX does not CSE broadcast_in_dim): one lane iota is
    # reused for the one-hot gather, the argmax lane ids, and the token
    # column-scatter (all are (BP, 128) because TOK_PAD == V == 128).
    lane_iota = lax.broadcasted_iota(jnp.int32, (BP, V), 1)

    htab = htab_ref[...]                                     # bf16 (V, H)
    wv = wv_ref[...]                                         # bf16 (H, V)

    cur = tok0_ref[...]                                      # i32 (BP, 1), vregs
    tok_acc = jnp.zeros((BP, TOK_PAD), jnp.int32)            # vreg accumulator

    for t in range(MAX_NEW_TOKENS):                          # static unroll
        # Embedding gather + first layer as ONE one-hot MXU matmul against the
        # pre-folded table: h = tanh(emb[cur] @ Wh + bh) == onehot @ H_tab.
        onehot = (lane_iota == cur).astype(jnp.bfloat16)     # bf16 (BP, V)
        h = jnp.dot(onehot, htab,
                    preferred_element_type=jnp.float32)      # f32 (BP, H)
        hs_ref[t] = h

        # logits = h @ Wv ; greedy argmax over vocab with first-max tie-break
        # (torch.argmax semantics): max + masked-min, two XLU reductions.
        logits = jnp.dot(h.astype(jnp.bfloat16), wv,
                         preferred_element_type=jnp.float32)  # f32 (BP, V)
        mx = jnp.max(logits, axis=-1, keepdims=True)
        cand = jnp.where(logits >= mx, lane_iota, jnp.int32(V))
        nxt = jnp.min(cand, axis=-1, keepdims=True)           # i32 (BP, 1)

        # ForcedEOSTokenLogitsProcessor: force EOS on the final new token.
        if t == MAX_NEW_TOKENS - 1:
            nxt = jnp.full_like(nxt, EOS_ID)

        # Carry in vregs + lane-dense token accumulation (column t).
        cur = nxt
        tok_acc = jnp.where(lane_iota == t, nxt, tok_acc)

    tok_ref[...] = tok_acc                                    # single writeback


def generate_fused(tok0, htab, wv):
    """Single pallas_call running the whole greedy generate loop (grid=(1,))."""
    return pl.pallas_call(
        _generate_kernel,
        out_shape=(jax.ShapeDtypeStruct((MAX_NEW_TOKENS, BP, H), jnp.float32),
                   jax.ShapeDtypeStruct((BP, TOK_PAD), jnp.int32)),
        grid_spec=pltpu.PrefetchScalarGridSpec(
            num_scalar_prefetch=0,
            grid=(1,),
            in_specs=[pl.BlockSpec((BP, 1), lambda i: (0, 0)),   # tok0
                      pl.BlockSpec((V, H), lambda i: (0, 0)),    # H_tab
                      pl.BlockSpec((H, V), lambda i: (0, 0))],   # Wv
            out_specs=(pl.BlockSpec((MAX_NEW_TOKENS, BP, H),
                                    lambda i: (0, 0, 0)),
                       pl.BlockSpec((BP, TOK_PAD), lambda i: (0, 0)))),
        compiler_params=pltpu.CompilerParams(
            dimension_semantics=("arbitrary",)),
    )(tok0, htab, wv)


# ------------------------- Describer.forward (greedy) -----------------------
def _describer_forward_core(input_ids, params):
    emb, wh, bh, wv = params

    # Offline algebraic fold of embed -> tanh(x @ Wh + bh) into a single
    # (V, H) lookup table (exact for this stateless synthetic decoder).
    htab = jnp.tanh(
        jnp.dot(emb.astype(jnp.float32), wh.astype(jnp.float32),
                preferred_element_type=jnp.float32) + bh).astype(jnp.bfloat16)

    # Pad the batch to 8 sublanes; extra rows decode garbage and are sliced off.
    last = input_ids[:, -1].astype(jnp.int32)                    # (B,)
    tok0 = jnp.zeros((BP, 1), jnp.int32).at[:B, 0].set(last)

    hs_pad, tok_pad = generate_fused(tok0, htab, wv)
    new_tokens = tok_pad[:B, :MAX_NEW_TOKENS]                    # (B, T)
    seq = jnp.concatenate(
        [input_ids, new_tokens.astype(input_ids.dtype)], axis=1)  # (B, L_tot)
    hs = hs_pad[:, :B, :]                                         # (T, B, H)

    # torch: where(seq == eos)[1].view(B, -1)[:, 1] - seq.shape[1]
    # -> column of the SECOND EOS occurrence per row, made negative.
    total_len = seq.shape[1]
    is_eos = seq == EOS_ID
    cum = jnp.cumsum(is_eos.astype(jnp.int32), axis=1)
    second_col = jnp.argmax((cum == 2) & is_eos, axis=1)          # (B,)
    eos_pos = second_col - total_len                              # negative
    # hidden_states[p][-1][i]: negative step index into the per-step stack.
    # Clamp guards the original code's "2nd EOS is in the generated region"
    # assumption (same fragile assumption as the torch code).
    step_idx = jnp.clip(eos_pos + MAX_NEW_TOKENS, 0, MAX_NEW_TOKENS - 1)

    # Vectorized per-row gather of the sentence embeddings.
    sent_emb = hs[step_idx, jnp.arange(B), :]                     # (B, H)
    # output_sequences[i] = sequences[i][max_input_length:]
    out_seq = seq[:, MAX_INPUT_LEN:]                              # (B, T)
    return sent_emb, out_seq


_forward_jit = jax.jit(_describer_forward_core)


def describer_forward(input_ids, params):
    sent_emb, out_seq = _forward_jit(input_ids, params)
    # Mirror the torch interface (list of per-row tensors); the heavy lifting
    # above is fully vectorized, this is presentation-only slicing.
    sentence_embeddings = [sent_emb[i][None, :] for i in range(B)]
    output_sequences = [out_seq[i][None, :] for i in range(B)]
    # TODO(synk): beam-search / beam-sample branches of the original forward
    # depend on HF BeamSearch internals (beam_indices) and are not modeled.
    return sentence_embeddings, output_sequences


# ----------------------------------- main ------------------------------------
if __name__ == "__main__":
    key = jax.random.PRNGKey(0)
    k1, k2, k3, k4, k5 = jax.random.split(key, 5)

    # deterministic synthetic "LLM" parameters (bf16 weights, f32 bias)
    emb = (jax.random.normal(k1, (V, H), jnp.float32) * 0.1).astype(jnp.bfloat16)
    wh = (jax.random.normal(k2, (H, H), jnp.float32) * 0.1).astype(jnp.bfloat16)
    bh = jax.random.normal(k3, (1, H), jnp.float32) * 0.1
    wv = (jax.random.normal(k4, (H, V), jnp.float32) * 0.1).astype(jnp.bfloat16)
    params = (emb, wh, bh, wv)

    # prompt: EOS at position 0 (so the 2nd EOS lands in the generated region,
    # matching the original code's assumption), rest are non-EOS tokens.
    body = jax.random.randint(k5, (B, MAX_INPUT_LEN - 1), 3, V, dtype=jnp.int32)
    input_ids = jnp.concatenate(
        [jnp.full((B, 1), EOS_ID, jnp.int32), body], axis=1)     # (2, 8)

    sentence_embeddings, output_sequences = describer_forward(input_ids, params)

    for e in sentence_embeddings:
        jax.block_until_ready(e)
    for s in output_sequences:
        jax.block_until_ready(s)

    assert sentence_embeddings[0].shape == (1, H)
    assert output_sequences[0].shape == (1, MAX_NEW_TOKENS)
    print("KERNEL_OK")
</pallas_src>

<mosaic_0001>
module attributes {stable_mosaic.version = 11 : i64} {
  func.func @_generate_kernel(%arg0: i32, %arg1: memref<8x1xi32, #tpu.memory_space<vmem>>, %arg2: memref<128x128xbf16, #tpu.memory_space<vmem>>, %arg3: memref<128x128xbf16, #tpu.memory_space<vmem>>, %arg4: memref<4x8x128xf32, #tpu.memory_space<vmem>>, %arg5: memref<8x128xi32, #tpu.memory_space<vmem>>) attributes {dimension_semantics = [#tpu.dimension_semantics<arbitrary>], iteration_bounds = array<i64: 1>, scalar_prefetch = 0 : i64, scratch_operands = 0 : i64, tpu.core_type = #tpu.core_type<tc>, window_params = [{pipeline_mode = #tpu.pipeline_mode<synchronous>, transform_indices = @transform_0, window_bounds = array<i64: 8, 1>}, {pipeline_mode = #tpu.pipeline_mode<synchronous>, transform_indices = @transform_1, window_bounds = array<i64: 128, 128>}, {pipeline_mode = #tpu.pipeline_mode<synchronous>, transform_indices = @transform_2, window_bounds = array<i64: 128, 128>}, {pipeline_mode = #tpu.pipeline_mode<synchronous>, transform_indices = @transform_3, window_bounds = array<i64: 4, 8, 128>}, {pipeline_mode = #tpu.pipeline_mode<synchronous>, transform_indices = @transform_4, window_bounds = array<i64: 8, 128>}]} {
    %0 = tpu.iota {dimensions = array<i32: 1>} : vector<8x128xi32>
    %c0 = arith.constant 0 : index
    %c0_0 = arith.constant 0 : index
    %1 = vector.load %arg2[%c0, %c0_0] : memref<128x128xbf16, #tpu.memory_space<vmem>>, vector<128x128xbf16>
    %c0_1 = arith.constant 0 : index
    %c0_2 = arith.constant 0 : index
    %2 = vector.load %arg3[%c0_1, %c0_2] : memref<128x128xbf16, #tpu.memory_space<vmem>>, vector<128x128xbf16>
    %c0_3 = arith.constant 0 : index
    %c0_4 = arith.constant 0 : index
    %3 = vector.load %arg1[%c0_3, %c0_4] : memref<8x1xi32, #tpu.memory_space<vmem>>, vector<8x1xi32>
    %c0_i32 = arith.constant 0 : i32
    %4 = vector.broadcast %c0_i32 : i32 to vector<8x128xi32>
    %5 = vector.broadcast %3 : vector<8x1xi32> to vector<8x128xi32>
    %6 = arith.cmpi eq, %0, %5 : vector<8x128xi32>
    %7 = arith.extui %6 : vector<8x128xi1> to vector<8x128xi32>
    %8 = arith.sitofp %7 : vector<8x128xi32> to vector<8x128xf32>
    %9 = arith.truncf %8 : vector<8x128xf32> to vector<8x128xbf16>
    %cst = arith.constant dense<0.000000e+00> : vector<8x128xf32>
    %10 = tpu.matmul %9, %1, %cst {dimension_numbers = #tpu.dot_dimension_numbers<[1], [0], [0], [1], [0, 0, 1, 1], [], []>} : vector<8x128xbf16>, vector<128x128xbf16>, vector<8x128xf32> -> vector<8x128xf32>
    %c0_5 = arith.constant 0 : index
    %c0_6 = arith.constant 0 : index
    %c0_7 = arith.constant 0 : index
    %11 = vector.load %arg4[%c0_5, %c0_6, %c0_7] : memref<4x8x128xf32, #tpu.memory_space<vmem>>, vector<1x8x128xf32>
    %12 = vector.shape_cast %11 : vector<1x8x128xf32> to vector<8x128xf32>
    %13 = vector.shape_cast %10 : vector<8x128xf32> to vector<1x8x128xf32>
    tpu.vector_store %arg4[%c0_5, %c0_6, %c0_7], %13 {strides = array<i32>} : memref<4x8x128xf32, #tpu.memory_space<vmem>>, vector<1x8x128xf32>,
    %14 = arith.truncf %10 : vector<8x128xf32> to vector<8x128xbf16>
    %cst_8 = arith.constant dense<0.000000e+00> : vector<8x128xf32>
    %15 = tpu.matmul %14, %2, %cst_8 {dimension_numbers = #tpu.dot_dimension_numbers<[1], [0], [0], [1], [0, 0, 1, 1], [], []>} : vector<8x128xbf16>, vector<128x128xbf16>, vector<8x128xf32> -> vector<8x128xf32>
    %cst_9 = arith.constant dense<0xFF800000> : vector<8xf32>
    %16 = vector.multi_reduction <maximumf>, %15, %cst_9 [1] : vector<8x128xf32> to vector<8xf32>
    %17 = vector.shape_cast %16 : vector<8xf32> to vector<8x1xf32>
    %18 = vector.broadcast %17 : vector<8x1xf32> to vector<8x128xf32>
    %19 = arith.cmpf oge, %15, %18 : vector<8x128xf32>
    %c128_i32 = arith.constant 128 : i32
    %20 = vector.broadcast %c128_i32 : i32 to vector<8x128xi32>
    %21 = arith.select %19, %0, %20 : vector<8x128xi1>, vector<8x128xi32>
    %cst_10 = arith.constant dense<2147483647> : vector<8xi32>
    %22 = vector.multi_reduction <minsi>, %21, %cst_10 [1] : vector<8x128xi32> to vector<8xi32>
    %23 = vector.shape_cast %22 : vector<8xi32> to vector<8x1xi32>
    %c0_i32_11 = arith.constant 0 : i32
    %24 = vector.broadcast %c0_i32_11 : i32 to vector<8x128xi32>
    %25 = arith.cmpi eq, %0, %24 : vector<8x128xi32>
    %26 = vector.shape_cast %23 : vector<8x1xi32> to vector<8x1xi32>
    %27 = vector.broadcast %26 : vector<8x1xi32> to vector<8x128xi32>
    %28 = arith.select %25, %27, %4 : vector<8x128xi1>, vector<8x128xi32>
    %29 = vector.broadcast %23 : vector<8x1xi32> to vector<8x128xi32>
    %30 = arith.cmpi eq, %0, %29 : vector<8x128xi32>
    %31 = arith.extui %30 : vector<8x128xi1> to vector<8x128xi32>
    %32 = arith.sitofp %31 : vector<8x128xi32> to vector<8x128xf32>
    %33 = arith.truncf %32 : vector<8x128xf32> to vector<8x128xbf16>
    %cst_12 = arith.constant dense<0.000000e+00> : vector<8x128xf32>
    %34 = tpu.matmul %33, %1, %cst_12 {dimension_numbers = #tpu.dot_dimension_numbers<[1], [0], [0], [1], [0, 0, 1, 1], [], []>} : vector<8x128xbf16>, vector<128x128xbf16>, vector<8x128xf32> -> vector<8x128xf32>
    %c1 = arith.constant 1 : index
    %c0_13 = arith.constant 0 : index
    %c0_14 = arith.constant 0 : index
    %35 = vector.load %arg4[%c1, %c0_13, %c0_14] : memref<4x8x128xf32, #tpu.memory_space<vmem>>, vector<1x8x128xf32>
    %36 = vector.shape_cast %35 : vector<1x8x128xf32> to vector<8x128xf32>
    %37 = vector.shape_cast %34 : vector<8x128xf32> to vector<1x8x128xf32>
    tpu.vector_store %arg4[%c1, %c0_13, %c0_14], %37 {strides = array<i32>} : memref<4x8x128xf32, #tpu.memory_space<vmem>>, vector<1x8x128xf32>,
    %38 = arith.truncf %34 : vector<8x128xf32> to vector<8x128xbf16>
    %cst_15 = arith.constant dense<0.000000e+00> : vector<8x128xf32>
    %39 = tpu.matmul %38, %2, %cst_15 {dimension_numbers = #tpu.dot_dimension_numbers<[1], [0], [0], [1], [0, 0, 1, 1], [], []>} : vector<8x128xbf16>, vector<128x128xbf16>, vector<8x128xf32> -> vector<8x128xf32>
    %cst_16 = arith.constant dense<0xFF800000> : vector<8xf32>
    %40 = vector.multi_reduction <maximumf>, %39, %cst_16 [1] : vector<8x128xf32> to vector<8xf32>
    %41 = vector.shape_cast %40 : vector<8xf32> to vector<8x1xf32>
    %42 = vector.broadcast %41 : vector<8x1xf32> to vector<8x128xf32>
    %43 = arith.cmpf oge, %39, %42 : vector<8x128xf32>
    %c128_i32_17 = arith.constant 128 : i32
    %44 = vector.broadcast %c128_i32_17 : i32 to vector<8x128xi32>
    %45 = arith.select %43, %0, %44 : vector<8x128xi1>, vector<8x128xi32>
    %cst_18 = arith.constant dense<2147483647> : vector<8xi32>
    %46 = vector.multi_reduction <minsi>, %45, %cst_18 [1] : vector<8x128xi32> to vector<8xi32>
    %47 = vector.shape_cast %46 : vector<8xi32> to vector<8x1xi32>
    %c1_i32 = arith.constant 1 : i32
    %48 = vector.broadcast %c1_i32 : i32 to vector<8x128xi32>
    %49 = arith.cmpi eq, %0, %48 : vector<8x128xi32>
    %50 = vector.shape_cast %47 : vector<8x1xi32> to vector<8x1xi32>
    %51 = vector.broadcast %50 : vector<8x1xi32> to vector<8x128xi32>
    %52 = arith.select %49, %51, %28 : vector<8x128xi1>, vector<8x128xi32>
    %53 = vector.broadcast %47 : vector<8x1xi32> to vector<8x128xi32>
    %54 = arith.cmpi eq, %0, %53 : vector<8x128xi32>
    %55 = arith.extui %54 : vector<8x128xi1> to vector<8x128xi32>
    %56 = arith.sitofp %55 : vector<8x128xi32> to vector<8x128xf32>
    %57 = arith.truncf %56 : vector<8x128xf32> to vector<8x128xbf16>
    %cst_19 = arith.constant dense<0.000000e+00> : vector<8x128xf32>
    %58 = tpu.matmul %57, %1, %cst_19 {dimension_numbers = #tpu.dot_dimension_numbers<[1], [0], [0], [1], [0, 0, 1, 1], [], []>} : vector<8x128xbf16>, vector<128x128xbf16>, vector<8x128xf32> -> vector<8x128xf32>
    %c2 = arith.constant 2 : index
    %c0_20 = arith.constant 0 : index
    %c0_21 = arith.constant 0 : index
    %59 = vector.load %arg4[%c2, %c0_20, %c0_21] : memref<4x8x128xf32, #tpu.memory_space<vmem>>, vector<1x8x128xf32>
    %60 = vector.shape_cast %59 : vector<1x8x128xf32> to vector<8x128xf32>
    %61 = vector.shape_cast %58 : vector<8x128xf32> to vector<1x8x128xf32>
    tpu.vector_store %arg4[%c2, %c0_20, %c0_21], %61 {strides = array<i32>} : memref<4x8x128xf32, #tpu.memory_space<vmem>>, vector<1x8x128xf32>,
    %62 = arith.truncf %58 : vector<8x128xf32> to vector<8x128xbf16>
    %cst_22 = arith.constant dense<0.000000e+00> : vector<8x128xf32>
    %63 = tpu.matmul %62, %2, %cst_22 {dimension_numbers = #tpu.dot_dimension_numbers<[1], [0], [0], [1], [0, 0, 1, 1], [], []>} : vector<8x128xbf16>, vector<128x128xbf16>, vector<8x128xf32> -> vector<8x128xf32>
    %cst_23 = arith.constant dense<0xFF800000> : vector<8xf32>
    %64 = vector.multi_reduction <maximumf>, %63, %cst_23 [1] : vector<8x128xf32> to vector<8xf32>
    %65 = vector.shape_cast %64 : vector<8xf32> to vector<8x1xf32>
    %66 = vector.broadcast %65 : vector<8x1xf32> to vector<8x128xf32>
    %67 = arith.cmpf oge, %63, %66 : vector<8x128xf32>
    %c128_i32_24 = arith.constant 128 : i32
    %68 = vector.broadcast %c128_i32_24 : i32 to vector<8x128xi32>
    %69 = arith.select %67, %0, %68 : vector<8x128xi1>, vector<8x128xi32>
    %cst_25 = arith.constant dense<2147483647> : vector<8xi32>
    %70 = vector.multi_reduction <minsi>, %69, %cst_25 [1] : vector<8x128xi32> to vector<8xi32>
    %71 = vector.shape_cast %70 : vector<8xi32> to vector<8x1xi32>
    %c2_i32 = arith.constant 2 : i32
    %72 = vector.broadcast %c2_i32 : i32 to vector<8x128xi32>
    %73 = arith.cmpi eq, %0, %72 : vector<8x128xi32>
    %74 = vector.shape_cast %71 : vector<8x1xi32> to vector<8x1xi32>
    %75 = vector.broadcast %74 : vector<8x1xi32> to vector<8x128xi32>
    %76 = arith.select %73, %75, %52 : vector<8x128xi1>, vector<8x128xi32>
    %77 = vector.broadcast %71 : vector<8x1xi32> to vector<8x128xi32>
    %78 = arith.cmpi eq, %0, %77 : vector<8x128xi32>
    %79 = arith.extui %78 : vector<8x128xi1> to vector<8x128xi32>
    %80 = arith.sitofp %79 : vector<8x128xi32> to vector<8x128xf32>
    %81 = arith.truncf %80 : vector<8x128xf32> to vector<8x128xbf16>
    %cst_26 = arith.constant dense<0.000000e+00> : vector<8x128xf32>
    %82 = tpu.matmul %81, %1, %cst_26 {dimension_numbers = #tpu.dot_dimension_numbers<[1], [0], [0], [1], [0, 0, 1, 1], [], []>} : vector<8x128xbf16>, vector<128x128xbf16>, vector<8x128xf32> -> vector<8x128xf32>
    %c3 = arith.constant 3 : index
    %c0_27 = arith.constant 0 : index
    %c0_28 = arith.constant 0 : index
    %83 = vector.load %arg4[%c3, %c0_27, %c0_28] : memref<4x8x128xf32, #tpu.memory_space<vmem>>, vector<1x8x128xf32>
    %84 = vector.shape_cast %83 : vector<1x8x128xf32> to vector<8x128xf32>
    %85 = vector.shape_cast %82 : vector<8x128xf32> to vector<1x8x128xf32>
    tpu.vector_store %arg4[%c3, %c0_27, %c0_28], %85 {strides = array<i32>} : memref<4x8x128xf32, #tpu.memory_space<vmem>>, vector<1x8x128xf32>,
    %c2_i32_29 = arith.constant 2 : i32
    %86 = vector.broadcast %c2_i32_29 : i32 to vector<8x1xi32>
    %c3_i32 = arith.constant 3 : i32
    %87 = vector.broadcast %c3_i32 : i32 to vector<8x128xi32>
    %88 = arith.cmpi eq, %0, %87 : vector<8x128xi32>
    %89 = vector.shape_cast %86 : vector<8x1xi32> to vector<8x1xi32>
    %90 = vector.broadcast %89 : vector<8x1xi32> to vector<8x128xi32>
    %91 = arith.select %88, %90, %76 : vector<8x128xi1>, vector<8x128xi32>
    %c0_30 = arith.constant 0 : index
    %c0_31 = arith.constant 0 : index
    %92 = vector.load %arg5[%c0_30, %c0_31] : memref<8x128xi32, #tpu.memory_space<vmem>>, vector<8x128xi32>
    tpu.vector_store %arg5[%c0_30, %c0_31], %91 {strides = array<i32>} : memref<8x128xi32, #tpu.memory_space<vmem>>, vector<8x128xi32>,
    return
  }
  func.func @transform_0(%arg0: i32) -> (i32, i32) {
    %c0_i32 = arith.constant 0 : i32
    %c0_i32_0 = arith.constant 0 : i32
    %c0_i32_1 = arith.constant 0 : i32
    return %c0_i32, %c0_i32_0 : i32, i32
  }
  func.func @transform_1(%arg0: i32) -> (i32, i32) {
    %c0_i32 = arith.constant 0 : i32
    %c0_i32_0 = arith.constant 0 : i32
    %c0_i32_1 = arith.constant 0 : i32
    return %c0_i32, %c0_i32_0 : i32, i32
  }
  func.func @transform_2(%arg0: i32) -> (i32, i32) {
    %c0_i32 = arith.constant 0 : i32
    %c0_i32_0 = arith.constant 0 : i32
    %c0_i32_1 = arith.constant 0 : i32
    return %c0_i32, %c0_i32_0 : i32, i32
  }
  func.func @transform_3(%arg0: i32) -> (i32, i32, i32) {
    %c0_i32 = arith.constant 0 : i32
    %c0_i32_0 = arith.constant 0 : i32
    %c0_i32_1 = arith.constant 0 : i32
    %c0_i32_2 = arith.constant 0 : i32
    return %c0_i32, %c0_i32_0, %c0_i32_1 : i32, i32, i32
  }
  func.func @transform_4(%arg0: i32) -> (i32, i32) {
    %c0_i32 = arith.constant 0 : i32
    %c0_i32_0 = arith.constant 0 : i32
    %c0_i32_1 = arith.constant 0 : i32
    return %c0_i32, %c0_i32_0 : i32, i32
  }
}

</mosaic_0001>

<bundles_post_ra>
// kernel: _describer_forward_core.1
= control target key start
LH: loop header
LB: loop body
LE: loop exit
PB: predicated region body
PF: predicated region fallthrough
CT: control target
= control target key end

     0   :  { %v783_v0 = vmov 0   ;;  %v784_v2 = vmov 0.0   ;;  %vm785_vm0 = vmmov 0   ;;  %v17_v18 = vlaneseq  ;;  %s1057_s0 = inlined_call_operand.vmem [shape: s32[8,1], index: 0, kind: input, shape index: {}]   ;;  %s1058_s1 = inlined_call_operand.vmem [shape: bf16[128,128], index: 1, kind: input, shape index: {}]   ;;  %s1059_s2 = inlined_call_operand.vmem [shape: bf16[128,128], index: 2, kind: input, shape index: {}]   ;;  %s1060_s3 = inlined_call_operand.vmem [shape: f32[4,8,128], index: 3, kind: output, shape index: {0}]   ;;  %s1061_s4 = inlined_call_operand.vmem [shape: s32[8,128], index: 4, kind: output, shape index: {1}]  }
   0x1   :  { %766 = vset.pattern.permute.xlu0 %v783_v0  ;;  %v51_v1 = vld [vmem:[%s1057_s0] sm:$0xff]  ;;  %622 = vmatprep.subr.bf16.mxu0 %v784_v2  ;;  %v826_v4 = vld [vmem:[%s1058_s1 + $0x8] sm:$0xff]   ;;  %v837_v5 = vld [vmem:[%s1058_s1 + $0x10] sm:$0xff]   ;;  %v786_v21 = vmov 1.0|1.0  }
   0x2   :  { %53 = vperm.xlu0 %766, %v51_v1   ;;  %v819_v3 = vld [vmem:[%s1058_s1] sm:$0xff]   ;;  %642 = vmatprep.subr.bf16.mxu1 %v784_v2  ;;  %v849_v7 = vld [vmem:[%s1059_s2 + $0x8] sm:$0xff]   ;;  %v855_v8 = vld [vmem:[%s1058_s1 + $0x18] sm:$0xff]   ;;  %v926_v19 = vand.u32 127, %v17_v18 }
   0x3   :  { %623 = vmatpush3.bf16.msra.mxu0 %v819_v3  ;;  %638 = vmatprep.mubr.msk.bf16.mxu0 %vm785_vm0, %v784_v2  ;;  %v843_v6 = vld [vmem:[%s1059_s2] sm:$0xff]   ;;  %v863_v9 = vld [vmem:[%s1059_s2 + $0x10] sm:$0xff]   ;;  %v877_v11 = vld [vmem:[%s1059_s2 + $0x18] sm:$0xff]  }
   0x4   :  { %624 = vmatprep.subr.bf16.mxu0 %v784_v2  ;;  %658 = vmatprep.mubr.msk.bf16.mxu1 %vm785_vm0, %v784_v2  ;;  %v869_v10 = vld [vmem:[%s1058_s1 + $0x20] sm:$0xff]   ;;  %v883_v12 = vld [vmem:[%s1058_s1 + $0x28] sm:$0xff]   ;;  %v897_v14 = vld [vmem:[%s1058_s1 + $0x30] sm:$0xff]   ;;  %vm255_vm9 = vcmp.eq.s32.totalorder %v926_v19, 0  ;;  %vm362_vm10 = vcmp.eq.s32.totalorder %v926_v19, 1  ;;  %vm469_vm15 = vcmp.eq.s32.totalorder %v926_v19, 2 }
   0x5   :  { %643 = vmatpush3.bf16.msra.mxu1 %v843_v6  ;;  %v891_v13 = vld [vmem:[%s1059_s2 + $0x20] sm:$0xff]   ;;  %v905_v15 = vld [vmem:[%s1059_s2 + $0x28] sm:$0xff]   ;;  %v911_v16 = vld [vmem:[%s1058_s1 + $0x38] sm:$0xff]  }
   0x6   :  { %644 = vmatprep.subr.bf16.mxu1 %v784_v2  ;;  %v919_v17 = vld [vmem:[%s1059_s2 + $0x30] sm:$0xff]   ;;  %v951_v22 = vld [vmem:[%s1059_s2 + $0x38] sm:$0xff]  }
   0x7   :  { %625 = vmatpush3.bf16.msra.mxu0 %v826_v4 }
   0x8   :  { %626 = vmatprep.subr.bf16.mxu0 %v784_v2 }
   0x9   :  { %645 = vmatpush3.bf16.msra.mxu1 %v849_v7 }
   0xa   :  { %646 = vmatprep.subr.bf16.mxu1 %v784_v2 }
   0xb   :  { %627 = vmatpush3.bf16.msra.mxu0 %v837_v5 }
   0xc   :  { %628 = vmatprep.subr.bf16.mxu0 %v784_v2 }
   0xd   :  { %647 = vmatpush3.bf16.msra.mxu1 %v863_v9 }
   0xe   :  { %648 = vmatprep.subr.bf16.mxu1 %v784_v2 }
   0xf   :  { %629 = vmatpush3.bf16.msra.mxu0 %v855_v8 }
  0x10   :  { %630 = vmatprep.subr.bf16.mxu0 %v784_v2 }
  0x11   :  { %649 = vmatpush3.bf16.msra.mxu1 %v877_v11 }
  0x12   :  { %650 = vmatprep.subr.bf16.mxu1 %v784_v2 }
  0x13   :  { %631 = vmatpush3.bf16.msra.mxu0 %v869_v10 }
  0x14   :  { %632 = vmatprep.subr.bf16.mxu0 %v784_v2 }
  0x15   :  { %651 = vmatpush3.bf16.msra.mxu1 %v891_v13 }
  0x16   :  { %652 = vmatprep.subr.bf16.mxu1 %v784_v2 }
  0x17   :  { %633 = vmatpush3.bf16.msra.mxu0 %v883_v12 }
  0x18   :  { %634 = vmatprep.subr.bf16.mxu0 %v784_v2 }
  0x19   :  { %653 = vmatpush3.bf16.msra.mxu1 %v905_v15 }
  0x1a   :  { %654 = vmatprep.subr.bf16.mxu1 %v784_v2 }
  0x1b   :  { %635 = vmatpush3.bf16.msra.mxu0 %v897_v14 }
  0x1c   :  { %636 = vmatprep.subr.bf16.mxu0 %v784_v2 }
  0x1d   :  { %655 = vmatpush3.bf16.msra.mxu1 %v919_v17 }
  0x1e   :  { %656 = vmatprep.subr.bf16.mxu1 %v784_v2 }
  0x1f   :  { %637 = vmatpush3.bf16.msra.mxu0 %v911_v16 }
  0x20   :  { %662 = vmatprep.subr.bf16.mxu0 %v784_v2 }
  0x21   :  { %657 = vmatpush3.bf16.msra.mxu1 %v951_v22 }
  0x22   :  { %682 = vmatprep.subr.bf16.mxu1 %v784_v2 }
  0x81   :  { %v54_v20 = vpop.permute.xlu0 %53 }
  0x82   :  { %vm55_vm1 = vcmp.eq.s32.totalorder %v926_v19, %v54_v20 }
  0x83   :  { %vm537_vm2 = vmpackc.low %vm55_vm1, %vm55_vm1 }
  0x84   :  { %639 = vmatmul.mubr.msk.bf16.vlgmr.msra.gmra.mrb[0].mxu0 %vm537_vm2, %v786_v21 }
  0x85   :  { %663 = vmatpush3.bf16.msra.mxu0 %v819_v3  ;;  %678 = vmatprep.mubr.msk.bf16.mxu0 %vm785_vm0, %v784_v2 }
  0x86   :  { %664 = vmatprep.subr.bf16.mxu0 %v784_v2 }
  0x89   :  { %665 = vmatpush3.bf16.msra.mxu0 %v826_v4 }
  0x8a   :  { %666 = vmatprep.subr.bf16.mxu0 %v784_v2 }
  0x8d   :  { %667 = vmatpush3.bf16.msra.mxu0 %v837_v5 }
  0x8e   :  { %668 = vmatprep.subr.bf16.mxu0 %v784_v2 }
  0x91   :  { %669 = vmatpush3.bf16.msra.mxu0 %v855_v8 }
  0x92   :  { %670 = vmatprep.subr.bf16.mxu0 %v784_v2 }
  0x95   :  { %671 = vmatpush3.bf16.msra.mxu0 %v869_v10 }
  0x96   :  { %672 = vmatprep.subr.bf16.mxu0 %v784_v2 }
  0x99   :  { %673 = vmatpush3.bf16.msra.mxu0 %v883_v12 }
  0x9a   :  { %674 = vmatprep.subr.bf16.mxu0 %v784_v2 }
  0x9d   :  { %675 = vmatpush3.bf16.msra.mxu0 %v897_v14 }
  0x9e   :  { %676 = vmatprep.subr.bf16.mxu0 %v784_v2 }
  0xa1   :  { %677 = vmatpush3.bf16.msra.mxu0 %v911_v16 }
  0xa2   :  { %702 = vmatprep.subr.bf16.mxu0 %v784_v2 }
 0x157   :  { %v141_v23 = vpop.f32.mrb[0].mxu0 }
 0x158   :  { %147 = vst [vmem:[%s1060_s3] sm:$0xff] %v141_v23  ;;  %v148_v24 = vpack.c.bf16 %v141_v23, %v141_v23  ;;  %v640_v25 = vpop.f32.mrb[1].mxu0 }
 0x159   :  { %v144_v26 = vpop.f32.mrb[2].mxu0 }
 0x15a   :  { %v641_v27 = vpop.f32.mrb[3].mxu0  ;;  %659 = vmatmul.mubr.bf16.vlgmr.msra.gmra.mrb[0].mxu1 %v148_v24 }
 0x15b   :  { %683 = vmatpush3.bf16.msra.mxu1 %v843_v6  ;;  %698 = vmatprep.mubr.msk.bf16.mxu1 %vm785_vm0, %v784_v2 }
 0x15c   :  { %684 = vmatprep.subr.bf16.mxu1 %v784_v2 }
 0x15f   :  { %685 = vmatpush3.bf16.msra.mxu1 %v849_v7 }
 0x160   :  { %686 = vmatprep.subr.bf16.mxu1 %v784_v2 }
 0x163   :  { %687 = vmatpush3.bf16.msra.mxu1 %v863_v9 }
 0x164   :  { %688 = vmatprep.subr.bf16.mxu1 %v784_v2 }
 0x167   :  { %689 = vmatpush3.bf16.msra.mxu1 %v877_v11 }
 0x168   :  { %690 = vmatprep.subr.bf16.mxu1 %v784_v2 }
 0x16b   :  { %691 = vmatpush3.bf16.msra.mxu1 %v891_v13 }
 0x16c   :  { %692 = vmatprep.subr.bf16.mxu1 %v784_v2 }
 0x16f   :  { %693 = vmatpush3.bf16.msra.mxu1 %v905_v15 }
 0x170   :  { %694 = vmatprep.subr.bf16.mxu1 %v784_v2 }
 0x173   :  { %695 = vmatpush3.bf16.msra.mxu1 %v919_v17 }
 0x174   :  { %696 = vmatprep.subr.bf16.mxu1 %v784_v2 }
 0x177   :  { %697 = vmatpush3.bf16.msra.mxu1 %v951_v22 }
 0x178   :  { %722 = vmatprep.subr.bf16.mxu1 %v784_v2 }
 0x22d   :  { %v231_v28 = vpop.f32.mrb[0].mxu1 }
 0x22e   :  { %237 = vmax.xlane.f32.xlu0 %v231_v28  ;;  %v660_v29 = vpop.f32.mrb[1].mxu1 }
 0x22f   :  { %v234_v30 = vpop.f32.mrb[2].mxu1 }
 0x230   :  { %v661_v31 = vpop.f32.mrb[3].mxu1 }
 0x2bb   :  { %v238_v32 = vpop.xlane.xlu0 %237 }
 0x2bc   :  { %vm239_vm3 = vcmp.ge.f32.partialorder %v231_v28, %v238_v32 }
 0x2bd   :  { %v240_v33 = vsel %vm239_vm3, %v926_v19, 128 }
 0x2be   :  { %v242_v34 = vshra.s32 %v240_v33, 16  ;;  %v241_v36 = vand.u32 65535, %v240_v33 }
 0x2c0   :  { %v244_v35 = vcvt.s32.f32 %v242_v34  ;;  %v243_v38 = vcvt.s32.f32 %v241_v36 }
 0x2c2   :  { %245 = vmin.xlane.f32.xlu1 %v244_v35 }
 0x34f   :  { %v246_v37 = vpop.xlane.xlu1 %245 }
 0x350   :  { %vm247_vm4 = vcmp.eq.f32.partialorder %v244_v35, %v246_v37  ;;  %v252_v40 = vcvt.f32.s32 %v246_v37 }
 0x351   :  { %v248_v39 = vsel %vm247_vm4, %v243_v38, inf }
 0x352   :  { %249 = vmin.xlane.f32.xlu1 %v248_v39  ;;  %v253_v42 = vshll.u32 %v252_v40, 16 }
 0x3df   :  { %v250_v41 = vpop.xlane.xlu1 %249 }
 0x3e0   :  { %v251_v43 = vcvt.f32.s32 %v250_v41 }
 0x3e2   :  { %v977_v44 = vadd.s32 %v253_v42, %v251_v43 }
 0x3e4   :  { %vm257_vm5 = vcmp.eq.s32.totalorder %v926_v19, %v977_v44 }
 0x3e5   :  { %vm548_vm6 = vmpackc.low %vm257_vm5, %vm257_vm5 }
 0x3e6   :  { %679 = vmatmul.mubr.msk.bf16.vlgmr.msra.gmra.mrb[4].mxu0 %vm548_vm6, %v786_v21 }
 0x3e7   :  { %703 = vmatpush3.bf16.msra.mxu0 %v819_v3  ;;  %718 = vmatprep.mubr.msk.bf16.mxu0 %vm785_vm0, %v784_v2 }
 0x3e8   :  { %704 = vmatprep.subr.bf16.mxu0 %v784_v2 }
 0x3eb   :  { %705 = vmatpush3.bf16.msra.mxu0 %v826_v4 }
 0x3ec   :  { %706 = vmatprep.subr.bf16.mxu0 %v784_v2 }
 0x3ef   :  { %707 = vmatpush3.bf16.msra.mxu0 %v837_v5 }
 0x3f0   :  { %708 = vmatprep.subr.bf16.mxu0 %v784_v2 }
 0x3f3   :  { %709 = vmatpush3.bf16.msra.mxu0 %v855_v8 }
 0x3f4   :  { %710 = vmatprep.subr.bf16.mxu0 %v784_v2 }
 0x3f7   :  { %711 = vmatpush3.bf16.msra.mxu0 %v869_v10 }
 0x3f8   :  { %712 = vmatprep.subr.bf16.mxu0 %v784_v2 }
 0x3fb   :  { %713 = vmatpush3.bf16.msra.mxu0 %v883_v12 }
 0x3fc   :  { %714 = vmatprep.subr.bf16.mxu0 %v784_v2 }
 0x3ff   :  { %715 = vmatpush3.bf16.msra.mxu0 %v897_v14 }
 0x400   :  { %716 = vmatprep.subr.bf16.mxu0 %v784_v2 }
 0x403   :  { %717 = vmatpush3.bf16.msra.mxu0 %v911_v16 }
 0x404   :  { %742 = vmatprep.subr.bf16.mxu0 %v784_v2 }
 0x4b9   :  { %v295_v45 = vpop.f32.mrb[4].mxu0 }
 0x4ba   :  { %550 = vst [vmem:[%s1060_s3 + $0x8] sm:$0xff] %v295_v45  ;;  %v303_v46 = vpack.c.bf16 %v295_v45, %v295_v45  ;;  %v680_v47 = vpop.f32.mrb[5].mxu0 }
 0x4bb   :  { %v298_v48 = vpop.f32.mrb[6].mxu0 }
 0x4bc   :  { %v681_v49 = vpop.f32.mrb[7].mxu0  ;;  %699 = vmatmul.mubr.bf16.vlgmr.msra.gmra.mrb[4].mxu1 %v303_v46 }
 0x4bd   :  { %723 = vmatpush3.bf16.msra.mxu1 %v843_v6  ;;  %738 = vmatprep.mubr.msk.bf16.mxu1 %vm785_vm0, %v784_v2 }
 0x4be   :  { %724 = vmatprep.subr.bf16.mxu1 %v784_v2 }
 0x4c1   :  { %725 = vmatpush3.bf16.msra.mxu1 %v849_v7  ;;  %v256_v7 = vsel %vm255_vm9, %v977_v44, 0 }
 0x4c2   :  { %726 = vmatprep.subr.bf16.mxu1 %v784_v2 }
 0x4c5   :  { %727 = vmatpush3.bf16.msra.mxu1 %v863_v9 }
 0x4c6   :  { %728 = vmatprep.subr.bf16.mxu1 %v784_v2 }
 0x4c9   :  { %729 = vmatpush3.bf16.msra.mxu1 %v877_v11 }
 0x4ca   :  { %730 = vmatprep.subr.bf16.mxu1 %v784_v2 }
 0x4cd   :  { %731 = vmatpush3.bf16.msra.mxu1 %v891_v13 }
 0x4ce   :  { %732 = vmatprep.subr.bf16.mxu1 %v784_v2 }
 0x4d1   :  { %733 = vmatpush3.bf16.msra.mxu1 %v905_v15 }
 0x4d2   :  { %734 = vmatprep.subr.bf16.mxu1 %v784_v2 }
 0x4d5   :  { %735 = vmatpush3.bf16.msra.mxu1 %v919_v17 }
 0x4d6   :  { %736 = vmatprep.subr.bf16.mxu1 %v784_v2 }
 0x4d9   :  { %737 = vmatpush3.bf16.msra.mxu1 %v951_v22 }
 0x58f   :  { %v338_v50 = vpop.f32.mrb[4].mxu1 }
 0x590   :  { %344 = vmax.xlane.f32.xlu1 %v338_v50  ;;  %v700_v51 = vpop.f32.mrb[5].mxu1 }
 0x591   :  { %v341_v52 = vpop.f32.mrb[6].mxu1 }
 0x592   :  { %v701_v53 = vpop.f32.mrb[7].mxu1 }
 0x61d   :  { %v345_v54 = vpop.xlane.xlu1 %344 }
 0x61e   :  { %vm346_vm7 = vcmp.ge.f32.partialorder %v338_v50, %v345_v54 }
 0x61f   :  { %v347_v55 = vsel %vm346_vm7, %v926_v19, 128 }
 0x620   :  { %v349_v56 = vshra.s32 %v347_v55, 16  ;;  %v348_v58 = vand.u32 65535, %v347_v55 }
 0x622   :  { %v351_v57 = vcvt.s32.f32 %v349_v56  ;;  %v350_v60 = vcvt.s32.f32 %v348_v58 }
 0x624   :  { %352 = vmin.xlane.f32.xlu1 %v351_v57 }
 0x6b1   :  { %v353_v59 = vpop.xlane.xlu1 %352 }
 0x6b2   :  { %vm354_vm8 = vcmp.eq.f32.partialorder %v351_v57, %v353_v59  ;;  %v359_v62 = vcvt.f32.s32 %v353_v59 }
 0x6b3   :  { %v355_v61 = vsel %vm354_vm8, %v350_v60, inf }
 0x6b4   :  { %356 = vmin.xlane.f32.xlu1 %v355_v61  ;;  %v360_v0 = vshll.u32 %v359_v62, 16 }
 0x741   :  { %v357_v63 = vpop.xlane.xlu1 %356 }
 0x742   :  { %v358_v1 = vcvt.f32.s32 %v357_v63 }
 0x744   :  { %v361_v6 = vadd.s32 %v360_v0, %v358_v1 }
 0x746   :  { %v363_v9 = vsel %vm362_vm10, %v361_v6, %v256_v7  ;;  %vm364_vm11 = vcmp.eq.s32.totalorder %v926_v19, %v361_v6 }
 0x747   :  { %vm552_vm12 = vmpackc.low %vm364_vm11, %vm364_vm11 }
 0x748   :  { %719 = vmatmul.mubr.msk.bf16.vlgmr.msra.gmra.mrb[8].mxu0 %vm552_vm12, %v786_v21 }
 0x749   :  { %743 = vmatpush3.bf16.msra.mxu0 %v819_v3  ;;  %758 = vmatprep.mubr.msk.bf16.mxu0 %vm785_vm0, %v784_v2  ;;  %vm517_vm0 = vcmp.eq.s32.totalorder %v926_v19, 3 }
 0x74a   :  { %744 = vmatprep.subr.bf16.mxu0 %v784_v2 }
 0x74d   :  { %745 = vmatpush3.bf16.msra.mxu0 %v826_v4 }
 0x74e   :  { %746 = vmatprep.subr.bf16.mxu0 %v784_v2 }
 0x751   :  { %747 = vmatpush3.bf16.msra.mxu0 %v837_v5 }
 0x752   :  { %748 = vmatprep.subr.bf16.mxu0 %v784_v2 }
 0x755   :  { %749 = vmatpush3.bf16.msra.mxu0 %v855_v8 }
 0x756   :  { %750 = vmatprep.subr.bf16.mxu0 %v784_v2 }
 0x759   :  { %751 = vmatpush3.bf16.msra.mxu0 %v869_v10 }
 0x75a   :  { %752 = vmatprep.subr.bf16.mxu0 %v784_v2 }
 0x75d   :  { %753 = vmatpush3.bf16.msra.mxu0 %v883_v12 }
 0x75e   :  { %754 = vmatprep.subr.bf16.mxu0 %v784_v2 }
 0x761   :  { %755 = vmatpush3.bf16.msra.mxu0 %v897_v14 }
 0x762   :  { %756 = vmatprep.subr.bf16.mxu0 %v784_v2 }
 0x765   :  { %757 = vmatpush3.bf16.msra.mxu0 %v911_v16 }
 0x81b   :  { %v402_v3 = vpop.f32.mrb[8].mxu0 }
 0x81c   :  { %554 = vst [vmem:[%s1060_s3 + $0x10] sm:$0xff] %v402_v3  ;;  %v410_v4 = vpack.c.bf16 %v402_v3, %v402_v3  ;;  %v720_v5 = vpop.f32.mrb[9].mxu0 }
 0x81d   :  { %v405_v8 = vpop.f32.mrb[10].mxu0 }
 0x81e   :  { %v721_v10 = vpop.f32.mrb[11].mxu0  ;;  %739 = vmatmul.mubr.bf16.vlgmr.msra.gmra.mrb[8].mxu1 %v410_v4 }
 0x8f1   :  { %v445_v11 = vpop.f32.mrb[8].mxu1 }
 0x8f2   :  { %451 = vmax.xlane.f32.xlu1 %v445_v11  ;;  %v740_v12 = vpop.f32.mrb[9].mxu1 }
 0x8f3   :  { %v448_v13 = vpop.f32.mrb[10].mxu1 }
 0x8f4   :  { %v741_v15 = vpop.f32.mrb[11].mxu1 }
 0x97f   :  { %v452_v14 = vpop.xlane.xlu1 %451 }
 0x980   :  { %vm453_vm13 = vcmp.ge.f32.partialorder %v445_v11, %v452_v14 }
 0x981   :  { %v454_v2 = vsel %vm453_vm13, %v926_v19, 128 }
 0x982   :  { %v456_v16 = vshra.s32 %v454_v2, 16  ;;  %v455_v18 = vand.u32 65535, %v454_v2 }
 0x984   :  { %v458_v17 = vcvt.s32.f32 %v456_v16  ;;  %v457_v22 = vcvt.s32.f32 %v455_v18 }
 0x986   :  { %459 = vmin.xlane.f32.xlu1 %v458_v17 }
 0xa13   :  { %v460_v20 = vpop.xlane.xlu1 %459 }
 0xa14   :  { %vm461_vm14 = vcmp.eq.f32.partialorder %v458_v17, %v460_v20  ;;  %v466_v24 = vcvt.f32.s32 %v460_v20 }
 0xa15   :  { %v462_v23 = vsel %vm461_vm14, %v457_v22, inf }
 0xa16   :  { %463 = vmin.xlane.f32.xlu1 %v462_v23  ;;  %v467_v26 = vshll.u32 %v466_v24, 16 }
 0xaa3   :  { %v464_v25 = vpop.xlane.xlu1 %463 }
 0xaa4   :  { %v465_v27 = vcvt.f32.s32 %v464_v25 }
 0xaa6   :  { %v468_v28 = vadd.s32 %v467_v26, %v465_v27 }
 0xaa8   :  { %v470_v29 = vsel %vm469_vm15, %v468_v28, %v363_v9  ;;  %vm471_vm1 = vcmp.eq.s32.totalorder %v926_v19, %v468_v28 }
 0xaa9   :  { %vm556_vm2 = vmpackc.low %vm471_vm1, %vm471_vm1  ;;  %v518_v30 = vsel %vm517_vm0, 2, %v470_v29 }
 0xaaa   :  { %519 = vst [vmem:[%s1061_s4] sm:$0xff] %v518_v30  ;;  %759 = vmatmul.mubr.msk.bf16.vlgmr.msra.gmra.mrb[12].mxu0 %vm556_vm2, %v786_v21 }
 0xb7d   :  { %v509_v31 = vpop.f32.mrb[12].mxu0 }
 0xb7e   :  { %558 = vst [vmem:[%s1060_s3 + $0x18] sm:$0xff] %v509_v31  ;;  %v760_v32 = vpop.f32.mrb[13].mxu0 }
 0xb7f   :  { %v512_v33 = vpop.f32.mrb[14].mxu0 }
 0xb80   :  { %v761_v34 = vpop.f32.mrb[15].mxu0 }

</bundles_post_ra>
